<compile_context>
chip_gen: v7x
topology: tpu7x:2x2x1
jax: 0.10.0
libtpu: 0.0.40
codegen_flags: <defaults>
</compile_context>

<pallas_src>
import math

import jax
import jax.numpy as jnp
from jax import lax
from jax.experimental import pallas as pl
from jax.experimental.pallas import tpu as pltpu


def _attention_kernel(x_ref, wq_ref, bq_ref, wk_ref, bk_ref,
                      wv_ref, bv_ref, wo_ref, bproj_ref, out_ref,
                      k_s, v_s, o_acc):
    """Grid = (batch, q_tile, head).

    x_ref      : (T, C)       full sequence for this batch element (compute dtype)
    wq_ref     : (C, D)       this head's Q weight (scale folded in)
    bq_ref     : (1, D)       this head's Q bias (scale folded in), fp32
    wk_ref     : (H, C, D)    K weights, all heads
    bk_ref     : (H, 1, D)    K biases, fp32
    wv_ref     : (H, C, D)    V weights, all heads
    bv_ref     : (H, 1, D)    V biases, fp32
    wo_ref     : (D, C)       this head's slice of c_proj weight
    bproj_ref  : (1, C)       c_proj bias, fp32
    out_ref    : (Tq, C)      output block
    k_s, v_s   : (H, T, D)    VMEM scratch: K/V for the current batch element
    o_acc      : (Tq, C) f32  VMEM scratch: output-projection accumulator
    """
    i = pl.program_id(1)                 # q-tile index
    h = pl.program_id(2)                 # head index
    n_head, _, d_head = k_s.shape
    blk_t = out_ref.shape[0]
    cdt = k_s.dtype                      # compute dtype (bf16 or f32)
    neg_big = jnp.float32(-1e30)         # finite "masked" value (NaN-safe)

    # ---- K/V projection for the whole sequence & all heads, once per batch elem.
    @pl.when(jnp.logical_and(i == 0, h == 0))
    def _():
        xf = x_ref[...]                                          # (T, C)
        for hh in range(n_head):                                 # static unroll
            k_s[hh] = (jnp.dot(xf, wk_ref[hh],
                               preferred_element_type=jnp.float32)
                       + bk_ref[hh]).astype(cdt)
            v_s[hh] = (jnp.dot(xf, wv_ref[hh],
                               preferred_element_type=jnp.float32)
                       + bv_ref[hh]).astype(cdt)

    # ---- Q projection for this (q-tile, head); 1/sqrt(D) already folded in.
    q0 = pl.multiple_of(i * blk_t, blk_t)
    xq = x_ref[pl.ds(q0, blk_t), :]                              # (Tq, C) VMEM slice
    q = (jnp.dot(xq, wq_ref[...],
                 preferred_element_type=jnp.float32)
         + bq_ref[...]).astype(cdt)                              # (Tq, D)

    # ---- Flash-style online softmax over causal KV tiles (j <= i only).
    def kv_step(j, carry):
        m_prev, l_prev, acc_prev = carry
        kv0 = pl.multiple_of(j * blk_t, blk_t)
        k_j = k_s[h, pl.ds(kv0, blk_t), :]                       # (Tk, D)
        v_j = v_s[h, pl.ds(kv0, blk_t), :]                       # (Tk, D)
        # q @ k^T without materializing a transpose.
        s = lax.dot_general(q, k_j, (((1,), (1,)), ((), ())),
                            preferred_element_type=jnp.float32)  # (Tq, Tk)
        q_idx = i * blk_t + lax.broadcasted_iota(jnp.int32, s.shape, 0)
        k_idx = j * blk_t + lax.broadcasted_iota(jnp.int32, s.shape, 1)
        s = jnp.where(k_idx <= q_idx, s, neg_big)
        m_new = jnp.maximum(m_prev, jnp.max(s, axis=-1, keepdims=True))
        alpha = jnp.exp(m_prev - m_new)
        p = jnp.exp(s - m_new)
        l_new = alpha * l_prev + jnp.sum(p, axis=-1, keepdims=True)
        acc_new = alpha * acc_prev + jnp.dot(p.astype(cdt), v_j,
                                             preferred_element_type=jnp.float32)
        return m_new, l_new, acc_new

    carry0 = (jnp.full((blk_t, 1), neg_big, jnp.float32),
              jnp.zeros((blk_t, 1), jnp.float32),
              jnp.zeros((blk_t, d_head), jnp.float32))
    _, l_f, acc_f = lax.fori_loop(0, i + 1, kv_step, carry0)

    # Normalize once per q-tile; approximate reciprocal runs on the EUP slot.
    o_h = acc_f * pl.reciprocal(l_f, approx=True)                # (Tq, D) f32

    # ---- This head's slice of the output projection, accumulated over heads.
    contrib = jnp.dot(o_h.astype(cdt), wo_ref[...],
                      preferred_element_type=jnp.float32)        # (Tq, C)

    @pl.when(h == 0)
    def _():
        o_acc[...] = jnp.zeros_like(o_acc)

    o_acc[...] += contrib

    @pl.when(h == n_head - 1)
    def _():
        out_ref[...] = (o_acc[...] + bproj_ref[...]).astype(out_ref.dtype)


def causal_self_attention(x, w_attn, b_attn, w_proj, b_proj, *, n_head,
                          q_block=128, compute_dtype=jnp.bfloat16):
    """x: (B, T, C).  Weights in PyTorch nn.Linear layout:
       w_attn (3C, C), b_attn (3C,), w_proj (C, C), b_proj (C,)."""
    B, T, C = x.shape
    assert C % n_head == 0, "n_embed must be divisible by n_head"
    D = C // n_head
    blk_t = T if T <= q_block else q_block
    if T % blk_t != 0:
        raise ValueError(f"T={T} must be divisible by the q tile size {blk_t}")
    num_q_tiles = T // blk_t
    scale = 1.0 / math.sqrt(D)

    # ---- Weight prep (head-major, per-head contiguous, scale folded into Q).
    def per_head_in(w_rows):  # (C_out, C_in) -> (H, C_in, D)
        return jnp.transpose(w_rows).reshape(C, n_head, D).transpose(1, 0, 2)

    wq = (per_head_in(w_attn[0 * C:1 * C]) * scale).astype(compute_dtype)
    wk = per_head_in(w_attn[1 * C:2 * C]).astype(compute_dtype)
    wv = per_head_in(w_attn[2 * C:3 * C]).astype(compute_dtype)
    bq = (b_attn[0 * C:1 * C] * scale).reshape(n_head, 1, D).astype(jnp.float32)
    bk = b_attn[1 * C:2 * C].reshape(n_head, 1, D).astype(jnp.float32)
    bv = b_attn[2 * C:3 * C].reshape(n_head, 1, D).astype(jnp.float32)
    wo = jnp.transpose(w_proj).reshape(n_head, D, C).astype(compute_dtype)
    bo = b_proj.reshape(1, C).astype(jnp.float32)
    x_c = x.astype(compute_dtype)

    grid = (B, num_q_tiles, n_head)

    in_specs = [
        pl.BlockSpec((None, T, C), lambda b, i, h: (b, 0, 0)),      # x (full seq)
        pl.BlockSpec((None, C, D), lambda b, i, h: (h, 0, 0)),      # wq[h]
        pl.BlockSpec((None, 1, D), lambda b, i, h: (h, 0, 0)),      # bq[h]
        pl.BlockSpec((n_head, C, D), lambda b, i, h: (0, 0, 0)),    # wk (all heads)
        pl.BlockSpec((n_head, 1, D), lambda b, i, h: (0, 0, 0)),    # bk
        pl.BlockSpec((n_head, C, D), lambda b, i, h: (0, 0, 0)),    # wv (all heads)
        pl.BlockSpec((n_head, 1, D), lambda b, i, h: (0, 0, 0)),    # bv
        pl.BlockSpec((None, D, C), lambda b, i, h: (h, 0, 0)),      # wo[h]
        pl.BlockSpec((1, C), lambda b, i, h: (0, 0)),               # c_proj bias
    ]
    out_specs = pl.BlockSpec((None, blk_t, C), lambda b, i, h: (b, i, 0))

    return pl.pallas_call(
        _attention_kernel,
        out_shape=jax.ShapeDtypeStruct((B, T, C), x.dtype),
        grid=grid,
        in_specs=in_specs,
        out_specs=out_specs,
        scratch_shapes=[
            pltpu.VMEM((n_head, T, D), compute_dtype),   # K cache (all heads)
            pltpu.VMEM((n_head, T, D), compute_dtype),   # V cache (all heads)
            pltpu.VMEM((blk_t, C), jnp.float32),         # output-proj accumulator
        ],
        compiler_params=pltpu.CompilerParams(
            # q-tile / head axes carry VMEM scratch state -> "arbitrary";
            # batch axis is safe to shard across megacore TensorCores.
            dimension_semantics=("parallel", "arbitrary", "arbitrary"),
            vmem_limit_bytes=32 * 1024 * 1024,
        ),
    )(x_c, wq, bq, wk, bk, wv, bv, wo, bo)


def reference(x, w_attn, b_attn, w_proj, b_proj, *, n_head):
    """Plain-JAX fp32 reference mirroring the PyTorch forward exactly."""
    B, T, C = x.shape
    D = C // n_head
    hp = lax.Precision.HIGHEST
    qkv = jnp.einsum("btc,oc->bto", x, w_attn, precision=hp) + b_attn
    q, k, v = jnp.split(qkv, 3, axis=2)
    q = q.reshape(B, T, n_head, D).transpose(0, 2, 1, 3)
    k = k.reshape(B, T, n_head, D).transpose(0, 2, 1, 3)
    v = v.reshape(B, T, n_head, D).transpose(0, 2, 1, 3)
    s = jnp.einsum("bhqd,bhkd->bhqk", q, k, precision=hp) * (1.0 / math.sqrt(D))
    mask = jnp.tril(jnp.ones((T, T), dtype=bool))
    s = jnp.where(mask[None, None], s, -jnp.inf)
    p = jax.nn.softmax(s, axis=-1)
    y = jnp.einsum("bhqk,bhkd->bhqd", p, v, precision=hp)
    y = y.transpose(0, 2, 1, 3).reshape(B, T, C)
    return jnp.einsum("btc,oc->bto", y, w_proj, precision=hp) + b_proj


if __name__ == "__main__":
    # Small shapes consistent with the module: B=2, T=8 (== block_size), C=32, 4 heads.
    B, T, C, n_head = 2, 8, 32, 4

    key = jax.random.PRNGKey(0)
    kx, kw1, kb1, kw2, kb2 = jax.random.split(key, 5)

    x = jax.random.normal(kx, (B, T, C), dtype=jnp.float32)

    # PyTorch nn.Linear-style uniform(-1/sqrt(fan_in), 1/sqrt(fan_in)) init.
    bound = 1.0 / math.sqrt(C)
    w_attn = jax.random.uniform(kw1, (3 * C, C), jnp.float32, -bound, bound)
    b_attn = jax.random.uniform(kb1, (3 * C,), jnp.float32, -bound, bound)
    w_proj = jax.random.uniform(kw2, (C, C), jnp.float32, -bound, bound)
    b_proj = jax.random.uniform(kb2, (C,), jnp.float32, -bound, bound)

    ref = reference(x, w_attn, b_attn, w_proj, b_proj, n_head=n_head)

    # 1) fp32 compute path: validates kernel structure (heads, mask, flash softmax).
    out_f32 = causal_self_attention(x, w_attn, b_attn, w_proj, b_proj,
                                    n_head=n_head, compute_dtype=jnp.float32)
    out_f32 = jax.block_until_ready(out_f32)
    assert out_f32.shape == (B, T, C)
    err_f32 = float(jnp.max(jnp.abs(out_f32 - ref)))
    assert jnp.allclose(out_f32, ref, atol=1e-2, rtol=1e-2), (
        f"f32 kernel mismatch: max err {err_f32:.3e}")

    # 2) bf16 MXU path (the default, recommended fast path).
    out_bf16 = causal_self_attention(x, w_attn, b_attn, w_proj, b_proj,
                                     n_head=n_head, compute_dtype=jnp.bfloat16)
    out_bf16 = jax.block_until_ready(out_bf16)
    assert out_bf16.shape == (B, T, C)
    err_bf16 = float(jnp.max(jnp.abs(out_bf16 - ref)))
    assert jnp.allclose(out_bf16, ref, atol=5e-2, rtol=5e-2), (
        f"bf16 kernel mismatch: max err {err_bf16:.3e}")

    print("KERNEL_OK")
</pallas_src>

<mosaic_0001>
module attributes {stable_mosaic.version = 11 : i64} {
  func.func @_attention_kernel(%arg0: i32, %arg1: i32, %arg2: i32, %arg3: memref<1x8x32xf32, #tpu.memory_space<vmem>>, %arg4: memref<1x32x8xf32, #tpu.memory_space<vmem>>, %arg5: memref<1x1x8xf32, #tpu.memory_space<vmem>>, %arg6: memref<4x32x8xf32, #tpu.memory_space<vmem>>, %arg7: memref<4x1x8xf32, #tpu.memory_space<vmem>>, %arg8: memref<4x32x8xf32, #tpu.memory_space<vmem>>, %arg9: memref<4x1x8xf32, #tpu.memory_space<vmem>>, %arg10: memref<1x8x32xf32, #tpu.memory_space<vmem>>, %arg11: memref<1x32xf32, #tpu.memory_space<vmem>>, %arg12: memref<1x8x32xf32, #tpu.memory_space<vmem>>, %arg13: memref<4x8x8xf32, #tpu.memory_space<vmem>>, %arg14: memref<4x8x8xf32, #tpu.memory_space<vmem>>, %arg15: memref<8x32xf32, #tpu.memory_space<vmem>>) attributes {dimension_semantics = [#tpu.dimension_semantics<parallel>, #tpu.dimension_semantics<arbitrary>, #tpu.dimension_semantics<arbitrary>], iteration_bounds = array<i64: 2, 1, 4>, scalar_prefetch = 0 : i64, scratch_operands = 3 : i64, tpu.core_type = #tpu.core_type<tc>, window_params = [{transform_indices = @transform_0, window_bounds = array<i64: 1, 8, 32>}, {transform_indices = @transform_1, window_bounds = array<i64: 1, 32, 8>}, {transform_indices = @transform_2, window_bounds = array<i64: 1, 1, 8>}, {pipeline_mode = #tpu.pipeline_mode<synchronous>, transform_indices = @transform_3, window_bounds = array<i64: 4, 32, 8>}, {pipeline_mode = #tpu.pipeline_mode<synchronous>, transform_indices = @transform_4, window_bounds = array<i64: 4, 1, 8>}, {pipeline_mode = #tpu.pipeline_mode<synchronous>, transform_indices = @transform_5, window_bounds = array<i64: 4, 32, 8>}, {pipeline_mode = #tpu.pipeline_mode<synchronous>, transform_indices = @transform_6, window_bounds = array<i64: 4, 1, 8>}, {transform_indices = @transform_7, window_bounds = array<i64: 1, 8, 32>}, {pipeline_mode = #tpu.pipeline_mode<synchronous>, transform_indices = @transform_8, window_bounds = array<i64: 1, 32>}, {transform_indices = @transform_9, window_bounds = array<i64: 1, 8, 32>}]} {
    %c0_i32 = arith.constant 0 : i32
    %0 = arith.cmpi eq, %arg1, %c0_i32 : i32
    %c0_i32_0 = arith.constant 0 : i32
    %1 = arith.cmpi eq, %arg2, %c0_i32_0 : i32
    %2 = arith.andi %0, %1 : i1
    %3 = arith.extui %2 : i1 to i32
    %c0_i32_1 = arith.constant 0 : i32
    %4 = arith.cmpi ne, %3, %c0_i32_1 : i32
    scf.if %4 {
      %c0_26 = arith.constant 0 : index
      %c0_27 = arith.constant 0 : index
      %c0_28 = arith.constant 0 : index
      %39 = vector.load %arg3[%c0_26, %c0_27, %c0_28] : memref<1x8x32xf32, #tpu.memory_space<vmem>>, vector<1x8x32xf32>
      %40 = vector.shape_cast %39 : vector<1x8x32xf32> to vector<8x32xf32>
      %c0_29 = arith.constant 0 : index
      %c0_30 = arith.constant 0 : index
      %c0_31 = arith.constant 0 : index
      %41 = vector.load %arg6[%c0_29, %c0_30, %c0_31] : memref<4x32x8xf32, #tpu.memory_space<vmem>>, vector<1x32x8xf32>
      %42 = vector.shape_cast %41 : vector<1x32x8xf32> to vector<32x8xf32>
      %cst_32 = arith.constant dense<0.000000e+00> : vector<8x8xf32>
      %43 = tpu.matmul %40, %42, %cst_32 {dimension_numbers = #tpu.dot_dimension_numbers<[1], [0], [0], [1], [0, 0, 1, 1], [], []>} : vector<8x32xf32>, vector<32x8xf32>, vector<8x8xf32> -> vector<8x8xf32>
      %c0_33 = arith.constant 0 : index
      %c0_34 = arith.constant 0 : index
      %c0_35 = arith.constant 0 : index
      %44 = vector.load %arg7[%c0_33, %c0_34, %c0_35] : memref<4x1x8xf32, #tpu.memory_space<vmem>>, vector<1x1x8xf32>
      %45 = vector.shape_cast %44 : vector<1x1x8xf32> to vector<1x8xf32>
      %46 = vector.broadcast %45 : vector<1x8xf32> to vector<8x8xf32>
      %47 = arith.addf %43, %46 : vector<8x8xf32>
      %c0_36 = arith.constant 0 : index
      %c0_37 = arith.constant 0 : index
      %c0_38 = arith.constant 0 : index
      %48 = vector.load %arg13[%c0_36, %c0_37, %c0_38] : memref<4x8x8xf32, #tpu.memory_space<vmem>>, vector<1x8x8xf32>
      %49 = vector.shape_cast %48 : vector<1x8x8xf32> to vector<8x8xf32>
      %50 = vector.shape_cast %47 : vector<8x8xf32> to vector<1x8x8xf32>
      tpu.vector_store %arg13[%c0_36, %c0_37, %c0_38], %50 {strides = array<i32>} : memref<4x8x8xf32, #tpu.memory_space<vmem>>, vector<1x8x8xf32>,
      %c0_39 = arith.constant 0 : index
      %c0_40 = arith.constant 0 : index
      %c0_41 = arith.constant 0 : index
      %51 = vector.load %arg8[%c0_39, %c0_40, %c0_41] : memref<4x32x8xf32, #tpu.memory_space<vmem>>, vector<1x32x8xf32>
      %52 = vector.shape_cast %51 : vector<1x32x8xf32> to vector<32x8xf32>
      %cst_42 = arith.constant dense<0.000000e+00> : vector<8x8xf32>
      %53 = tpu.matmul %40, %52, %cst_42 {dimension_numbers = #tpu.dot_dimension_numbers<[1], [0], [0], [1], [0, 0, 1, 1], [], []>} : vector<8x32xf32>, vector<32x8xf32>, vector<8x8xf32> -> vector<8x8xf32>
      %c0_43 = arith.constant 0 : index
      %c0_44 = arith.constant 0 : index
      %c0_45 = arith.constant 0 : index
      %54 = vector.load %arg9[%c0_43, %c0_44, %c0_45] : memref<4x1x8xf32, #tpu.memory_space<vmem>>, vector<1x1x8xf32>
      %55 = vector.shape_cast %54 : vector<1x1x8xf32> to vector<1x8xf32>
      %56 = vector.broadcast %55 : vector<1x8xf32> to vector<8x8xf32>
      %57 = arith.addf %53, %56 : vector<8x8xf32>
      %c0_46 = arith.constant 0 : index
      %c0_47 = arith.constant 0 : index
      %c0_48 = arith.constant 0 : index
      %58 = vector.load %arg14[%c0_46, %c0_47, %c0_48] : memref<4x8x8xf32, #tpu.memory_space<vmem>>, vector<1x8x8xf32>
      %59 = vector.shape_cast %58 : vector<1x8x8xf32> to vector<8x8xf32>
      %60 = vector.shape_cast %57 : vector<8x8xf32> to vector<1x8x8xf32>
      tpu.vector_store %arg14[%c0_46, %c0_47, %c0_48], %60 {strides = array<i32>} : memref<4x8x8xf32, #tpu.memory_space<vmem>>, vector<1x8x8xf32>,
      %c1 = arith.constant 1 : index
      %c0_49 = arith.constant 0 : index
      %c0_50 = arith.constant 0 : index
      %61 = vector.load %arg6[%c1, %c0_49, %c0_50] : memref<4x32x8xf32, #tpu.memory_space<vmem>>, vector<1x32x8xf32>
      %62 = vector.shape_cast %61 : vector<1x32x8xf32> to vector<32x8xf32>
      %cst_51 = arith.constant dense<0.000000e+00> : vector<8x8xf32>
      %63 = tpu.matmul %40, %62, %cst_51 {dimension_numbers = #tpu.dot_dimension_numbers<[1], [0], [0], [1], [0, 0, 1, 1], [], []>} : vector<8x32xf32>, vector<32x8xf32>, vector<8x8xf32> -> vector<8x8xf32>
      %c1_52 = arith.constant 1 : index
      %c0_53 = arith.constant 0 : index
      %c0_54 = arith.constant 0 : index
      %64 = vector.load %arg7[%c1_52, %c0_53, %c0_54] : memref<4x1x8xf32, #tpu.memory_space<vmem>>, vector<1x1x8xf32>
      %65 = vector.shape_cast %64 : vector<1x1x8xf32> to vector<1x8xf32>
      %66 = vector.broadcast %65 : vector<1x8xf32> to vector<8x8xf32>
      %67 = arith.addf %63, %66 : vector<8x8xf32>
      %c1_55 = arith.constant 1 : index
      %c0_56 = arith.constant 0 : index
      %c0_57 = arith.constant 0 : index
      %68 = vector.load %arg13[%c1_55, %c0_56, %c0_57] : memref<4x8x8xf32, #tpu.memory_space<vmem>>, vector<1x8x8xf32>
      %69 = vector.shape_cast %68 : vector<1x8x8xf32> to vector<8x8xf32>
      %70 = vector.shape_cast %67 : vector<8x8xf32> to vector<1x8x8xf32>
      tpu.vector_store %arg13[%c1_55, %c0_56, %c0_57], %70 {strides = array<i32>} : memref<4x8x8xf32, #tpu.memory_space<vmem>>, vector<1x8x8xf32>,
      %c1_58 = arith.constant 1 : index
      %c0_59 = arith.constant 0 : index
      %c0_60 = arith.constant 0 : index
      %71 = vector.load %arg8[%c1_58, %c0_59, %c0_60] : memref<4x32x8xf32, #tpu.memory_space<vmem>>, vector<1x32x8xf32>
      %72 = vector.shape_cast %71 : vector<1x32x8xf32> to vector<32x8xf32>
      %cst_61 = arith.constant dense<0.000000e+00> : vector<8x8xf32>
      %73 = tpu.matmul %40, %72, %cst_61 {dimension_numbers = #tpu.dot_dimension_numbers<[1], [0], [0], [1], [0, 0, 1, 1], [], []>} : vector<8x32xf32>, vector<32x8xf32>, vector<8x8xf32> -> vector<8x8xf32>
      %c1_62 = arith.constant 1 : index
      %c0_63 = arith.constant 0 : index
      %c0_64 = arith.constant 0 : index
      %74 = vector.load %arg9[%c1_62, %c0_63, %c0_64] : memref<4x1x8xf32, #tpu.memory_space<vmem>>, vector<1x1x8xf32>
      %75 = vector.shape_cast %74 : vector<1x1x8xf32> to vector<1x8xf32>
      %76 = vector.broadcast %75 : vector<1x8xf32> to vector<8x8xf32>
      %77 = arith.addf %73, %76 : vector<8x8xf32>
      %c1_65 = arith.constant 1 : index
      %c0_66 = arith.constant 0 : index
      %c0_67 = arith.constant 0 : index
      %78 = vector.load %arg14[%c1_65, %c0_66, %c0_67] : memref<4x8x8xf32, #tpu.memory_space<vmem>>, vector<1x8x8xf32>
      %79 = vector.shape_cast %78 : vector<1x8x8xf32> to vector<8x8xf32>
      %80 = vector.shape_cast %77 : vector<8x8xf32> to vector<1x8x8xf32>
      tpu.vector_store %arg14[%c1_65, %c0_66, %c0_67], %80 {strides = array<i32>} : memref<4x8x8xf32, #tpu.memory_space<vmem>>, vector<1x8x8xf32>,
      %c2 = arith.constant 2 : index
      %c0_68 = arith.constant 0 : index
      %c0_69 = arith.constant 0 : index
      %81 = vector.load %arg6[%c2, %c0_68, %c0_69] : memref<4x32x8xf32, #tpu.memory_space<vmem>>, vector<1x32x8xf32>
      %82 = vector.shape_cast %81 : vector<1x32x8xf32> to vector<32x8xf32>
      %cst_70 = arith.constant dense<0.000000e+00> : vector<8x8xf32>
      %83 = tpu.matmul %40, %82, %cst_70 {dimension_numbers = #tpu.dot_dimension_numbers<[1], [0], [0], [1], [0, 0, 1, 1], [], []>} : vector<8x32xf32>, vector<32x8xf32>, vector<8x8xf32> -> vector<8x8xf32>
      %c2_71 = arith.constant 2 : index
      %c0_72 = arith.constant 0 : index
      %c0_73 = arith.constant 0 : index
      %84 = vector.load %arg7[%c2_71, %c0_72, %c0_73] : memref<4x1x8xf32, #tpu.memory_space<vmem>>, vector<1x1x8xf32>
      %85 = vector.shape_cast %84 : vector<1x1x8xf32> to vector<1x8xf32>
      %86 = vector.broadcast %85 : vector<1x8xf32> to vector<8x8xf32>
      %87 = arith.addf %83, %86 : vector<8x8xf32>
      %c2_74 = arith.constant 2 : index
      %c0_75 = arith.constant 0 : index
      %c0_76 = arith.constant 0 : index
      %88 = vector.load %arg13[%c2_74, %c0_75, %c0_76] : memref<4x8x8xf32, #tpu.memory_space<vmem>>, vector<1x8x8xf32>
      %89 = vector.shape_cast %88 : vector<1x8x8xf32> to vector<8x8xf32>
      %90 = vector.shape_cast %87 : vector<8x8xf32> to vector<1x8x8xf32>
      tpu.vector_store %arg13[%c2_74, %c0_75, %c0_76], %90 {strides = array<i32>} : memref<4x8x8xf32, #tpu.memory_space<vmem>>, vector<1x8x8xf32>,
      %c2_77 = arith.constant 2 : index
      %c0_78 = arith.constant 0 : index
      %c0_79 = arith.constant 0 : index
      %91 = vector.load %arg8[%c2_77, %c0_78, %c0_79] : memref<4x32x8xf32, #tpu.memory_space<vmem>>, vector<1x32x8xf32>
      %92 = vector.shape_cast %91 : vector<1x32x8xf32> to vector<32x8xf32>
      %cst_80 = arith.constant dense<0.000000e+00> : vector<8x8xf32>
      %93 = tpu.matmul %40, %92, %cst_80 {dimension_numbers = #tpu.dot_dimension_numbers<[1], [0], [0], [1], [0, 0, 1, 1], [], []>} : vector<8x32xf32>, vector<32x8xf32>, vector<8x8xf32> -> vector<8x8xf32>
      %c2_81 = arith.constant 2 : index
      %c0_82 = arith.constant 0 : index
      %c0_83 = arith.constant 0 : index
      %94 = vector.load %arg9[%c2_81, %c0_82, %c0_83] : memref<4x1x8xf32, #tpu.memory_space<vmem>>, vector<1x1x8xf32>
      %95 = vector.shape_cast %94 : vector<1x1x8xf32> to vector<1x8xf32>
      %96 = vector.broadcast %95 : vector<1x8xf32> to vector<8x8xf32>
      %97 = arith.addf %93, %96 : vector<8x8xf32>
      %c2_84 = arith.constant 2 : index
      %c0_85 = arith.constant 0 : index
      %c0_86 = arith.constant 0 : index
      %98 = vector.load %arg14[%c2_84, %c0_85, %c0_86] : memref<4x8x8xf32, #tpu.memory_space<vmem>>, vector<1x8x8xf32>
      %99 = vector.shape_cast %98 : vector<1x8x8xf32> to vector<8x8xf32>
      %100 = vector.shape_cast %97 : vector<8x8xf32> to vector<1x8x8xf32>
      tpu.vector_store %arg14[%c2_84, %c0_85, %c0_86], %100 {strides = array<i32>} : memref<4x8x8xf32, #tpu.memory_space<vmem>>, vector<1x8x8xf32>,
      %c3 = arith.constant 3 : index
      %c0_87 = arith.constant 0 : index
      %c0_88 = arith.constant 0 : index
      %101 = vector.load %arg6[%c3, %c0_87, %c0_88] : memref<4x32x8xf32, #tpu.memory_space<vmem>>, vector<1x32x8xf32>
      %102 = vector.shape_cast %101 : vector<1x32x8xf32> to vector<32x8xf32>
      %cst_89 = arith.constant dense<0.000000e+00> : vector<8x8xf32>
      %103 = tpu.matmul %40, %102, %cst_89 {dimension_numbers = #tpu.dot_dimension_numbers<[1], [0], [0], [1], [0, 0, 1, 1], [], []>} : vector<8x32xf32>, vector<32x8xf32>, vector<8x8xf32> -> vector<8x8xf32>
      %c3_90 = arith.constant 3 : index
      %c0_91 = arith.constant 0 : index
      %c0_92 = arith.constant 0 : index
      %104 = vector.load %arg7[%c3_90, %c0_91, %c0_92] : memref<4x1x8xf32, #tpu.memory_space<vmem>>, vector<1x1x8xf32>
      %105 = vector.shape_cast %104 : vector<1x1x8xf32> to vector<1x8xf32>
      %106 = vector.broadcast %105 : vector<1x8xf32> to vector<8x8xf32>
      %107 = arith.addf %103, %106 : vector<8x8xf32>
      %c3_93 = arith.constant 3 : index
      %c0_94 = arith.constant 0 : index
      %c0_95 = arith.constant 0 : index
      %108 = vector.load %arg13[%c3_93, %c0_94, %c0_95] : memref<4x8x8xf32, #tpu.memory_space<vmem>>, vector<1x8x8xf32>
      %109 = vector.shape_cast %108 : vector<1x8x8xf32> to vector<8x8xf32>
      %110 = vector.shape_cast %107 : vector<8x8xf32> to vector<1x8x8xf32>
      tpu.vector_store %arg13[%c3_93, %c0_94, %c0_95], %110 {strides = array<i32>} : memref<4x8x8xf32, #tpu.memory_space<vmem>>, vector<1x8x8xf32>,
      %c3_96 = arith.constant 3 : index
      %c0_97 = arith.constant 0 : index
      %c0_98 = arith.constant 0 : index
      %111 = vector.load %arg8[%c3_96, %c0_97, %c0_98] : memref<4x32x8xf32, #tpu.memory_space<vmem>>, vector<1x32x8xf32>
      %112 = vector.shape_cast %111 : vector<1x32x8xf32> to vector<32x8xf32>
      %cst_99 = arith.constant dense<0.000000e+00> : vector<8x8xf32>
      %113 = tpu.matmul %40, %112, %cst_99 {dimension_numbers = #tpu.dot_dimension_numbers<[1], [0], [0], [1], [0, 0, 1, 1], [], []>} : vector<8x32xf32>, vector<32x8xf32>, vector<8x8xf32> -> vector<8x8xf32>
      %c3_100 = arith.constant 3 : index
      %c0_101 = arith.constant 0 : index
      %c0_102 = arith.constant 0 : index
      %114 = vector.load %arg9[%c3_100, %c0_101, %c0_102] : memref<4x1x8xf32, #tpu.memory_space<vmem>>, vector<1x1x8xf32>
      %115 = vector.shape_cast %114 : vector<1x1x8xf32> to vector<1x8xf32>
      %116 = vector.broadcast %115 : vector<1x8xf32> to vector<8x8xf32>
      %117 = arith.addf %113, %116 : vector<8x8xf32>
      %c3_103 = arith.constant 3 : index
      %c0_104 = arith.constant 0 : index
      %c0_105 = arith.constant 0 : index
      %118 = vector.load %arg14[%c3_103, %c0_104, %c0_105] : memref<4x8x8xf32, #tpu.memory_space<vmem>>, vector<1x8x8xf32>
      %119 = vector.shape_cast %118 : vector<1x8x8xf32> to vector<8x8xf32>
      %120 = vector.shape_cast %117 : vector<8x8xf32> to vector<1x8x8xf32>
      tpu.vector_store %arg14[%c3_103, %c0_104, %c0_105], %120 {strides = array<i32>} : memref<4x8x8xf32, #tpu.memory_space<vmem>>, vector<1x8x8xf32>,
    } else {
    }
    %c8_i32 = arith.constant 8 : i32
    %5 = arith.muli %arg1, %c8_i32 : i32
    %6 = tpu.assume_multiple %5, 8 : i32
    %c0 = arith.constant 0 : index
    %7 = arith.index_cast %6 : i32 to index
    %c0_2 = arith.constant 0 : index
    %8 = vector.load %arg3[%c0, %7, %c0_2] : memref<1x8x32xf32, #tpu.memory_space<vmem>>, vector<1x8x32xf32>
    %9 = vector.shape_cast %8 : vector<1x8x32xf32> to vector<8x32xf32>
    %c0_3 = arith.constant 0 : index
    %c0_4 = arith.constant 0 : index
    %c0_5 = arith.constant 0 : index
    %10 = vector.load %arg4[%c0_3, %c0_4, %c0_5] : memref<1x32x8xf32, #tpu.memory_space<vmem>>, vector<1x32x8xf32>
    %11 = vector.shape_cast %10 : vector<1x32x8xf32> to vector<32x8xf32>
    %cst = arith.constant dense<0.000000e+00> : vector<8x8xf32>
    %12 = tpu.matmul %9, %11, %cst {dimension_numbers = #tpu.dot_dimension_numbers<[1], [0], [0], [1], [0, 0, 1, 1], [], []>} : vector<8x32xf32>, vector<32x8xf32>, vector<8x8xf32> -> vector<8x8xf32>
    %c0_6 = arith.constant 0 : index
    %c0_7 = arith.constant 0 : index
    %c0_8 = arith.constant 0 : index
    %13 = vector.load %arg5[%c0_6, %c0_7, %c0_8] : memref<1x1x8xf32, #tpu.memory_space<vmem>>, vector<1x1x8xf32>
    %14 = vector.shape_cast %13 : vector<1x1x8xf32> to vector<1x8xf32>
    %15 = vector.broadcast %14 : vector<1x8xf32> to vector<8x8xf32>
    %16 = arith.addf %12, %15 : vector<8x8xf32>
    %cst_9 = arith.constant -1.000000e+30 : f32
    %17 = vector.broadcast %cst_9 : f32 to vector<8x1xf32>
    %cst_10 = arith.constant 0.000000e+00 : f32
    %18 = vector.broadcast %cst_10 : f32 to vector<8x1xf32>
    %cst_11 = arith.constant 0.000000e+00 : f32
    %19 = vector.broadcast %cst_11 : f32 to vector<8x8xf32>
    %c1_i32 = arith.constant 1 : i32
    %20 = arith.addi %arg1, %c1_i32 : i32
    %cst_12 = arith.constant -1.000000e+30 : f32
    %c0_i32_13 = arith.constant 0 : i32
    %21 = arith.subi %20, %c0_i32_13 : i32
    %22 = arith.addi %c0_i32_13, %21 : i32
    %c1_i32_14 = arith.constant 1 : i32
    %23:3 = scf.for %arg16 = %c0_i32_13 to %22 step %c1_i32_14 iter_args(%arg17 = %17, %arg18 = %18, %arg19 = %19) -> (vector<8x1xf32>, vector<8x1xf32>, vector<8x8xf32>)  : i32 {
      %c8_i32_26 = arith.constant 8 : i32
      %39 = arith.muli %arg16, %c8_i32_26 : i32
      %40 = tpu.assume_multiple %39, 8 : i32
      %41 = arith.index_cast %arg2 : i32 to index
      %42 = arith.index_cast %40 : i32 to index
      %c0_27 = arith.constant 0 : index
      %43 = vector.load %arg13[%41, %42, %c0_27] : memref<4x8x8xf32, #tpu.memory_space<vmem>>, vector<1x8x8xf32>
      %44 = vector.shape_cast %43 : vector<1x8x8xf32> to vector<8x8xf32>
      %45 = arith.index_cast %arg2 : i32 to index
      %46 = arith.index_cast %40 : i32 to index
      %c0_28 = arith.constant 0 : index
      %47 = vector.load %arg14[%45, %46, %c0_28] : memref<4x8x8xf32, #tpu.memory_space<vmem>>, vector<1x8x8xf32>
      %48 = vector.shape_cast %47 : vector<1x8x8xf32> to vector<8x8xf32>
      %cst_29 = arith.constant dense<0.000000e+00> : vector<8x8xf32>
      %49 = tpu.matmul %16, %44, %cst_29 {dimension_numbers = #tpu.dot_dimension_numbers<[1], [1], [0], [0], [0, 0, 1, 0], [], []>} : vector<8x8xf32>, vector<8x8xf32>, vector<8x8xf32> -> vector<8x8xf32>
      %c8_i32_30 = arith.constant 8 : i32
      %50 = arith.muli %arg1, %c8_i32_30 : i32
      %51 = tpu.iota {dimensions = array<i32: 0>} : vector<8x8xi32>
      %52 = vector.broadcast %50 : i32 to vector<8x8xi32>
      %53 = arith.addi %52, %51 : vector<8x8xi32>
      %c8_i32_31 = arith.constant 8 : i32
      %54 = arith.muli %arg16, %c8_i32_31 : i32
      %55 = tpu.iota {dimensions = array<i32: 1>} : vector<8x8xi32>
      %56 = vector.broadcast %54 : i32 to vector<8x8xi32>
      %57 = arith.addi %56, %55 : vector<8x8xi32>
      %58 = arith.cmpi sle, %57, %53 : vector<8x8xi32>
      %59 = vector.broadcast %cst_12 : f32 to vector<8x8xf32>
      %60 = arith.select %58, %49, %59 : vector<8x8xi1>, vector<8x8xf32>
      %cst_32 = arith.constant dense<0xFF800000> : vector<8xf32>
      %61 = vector.multi_reduction <maximumf>, %60, %cst_32 [1] : vector<8x8xf32> to vector<8xf32>
      %62 = vector.shape_cast %61 : vector<8xf32> to vector<8x1xf32>
      %63 = arith.maximumf %arg17, %62 : vector<8x1xf32>
      %64 = arith.subf %arg17, %63 : vector<8x1xf32>
      %65 = math.exp %64 : vector<8x1xf32>
      %66 = vector.broadcast %63 : vector<8x1xf32> to vector<8x8xf32>
      %67 = arith.subf %60, %66 : vector<8x8xf32>
      %68 = math.exp %67 : vector<8x8xf32>
      %69 = arith.mulf %65, %arg18 : vector<8x1xf32>
      %cst_33 = arith.constant dense<0.000000e+00> : vector<8xf32>
      %70 = vector.multi_reduction <add>, %68, %cst_33 [1] : vector<8x8xf32> to vector<8xf32>
      %71 = vector.shape_cast %70 : vector<8xf32> to vector<8x1xf32>
      %72 = arith.addf %69, %71 : vector<8x1xf32>
      %73 = vector.broadcast %65 : vector<8x1xf32> to vector<8x8xf32>
      %74 = arith.mulf %73, %arg19 : vector<8x8xf32>
      %cst_34 = arith.constant dense<0.000000e+00> : vector<8x8xf32>
      %75 = tpu.matmul %68, %48, %cst_34 {dimension_numbers = #tpu.dot_dimension_numbers<[1], [0], [0], [1], [0, 0, 1, 1], [], []>} : vector<8x8xf32>, vector<8x8xf32>, vector<8x8xf32> -> vector<8x8xf32>
      %76 = arith.addf %74, %75 : vector<8x8xf32>
      scf.yield %63, %72, %76 : vector<8x1xf32>, vector<8x1xf32>, vector<8x8xf32>
    }
    %24 = tpu.reciprocal %23#1 {approx = true} : vector<8x1xf32> -> vector<8x1xf32>
    %25 = vector.broadcast %24 : vector<8x1xf32> to vector<8x8xf32>
    %26 = arith.mulf %23#2, %25 : vector<8x8xf32>
    %c0_15 = arith.constant 0 : index
    %c0_16 = arith.constant 0 : index
    %c0_17 = arith.constant 0 : index
    %27 = vector.load %arg10[%c0_15, %c0_16, %c0_17] : memref<1x8x32xf32, #tpu.memory_space<vmem>>, vector<1x8x32xf32>
    %28 = vector.shape_cast %27 : vector<1x8x32xf32> to vector<8x32xf32>
    %cst_18 = arith.constant dense<0.000000e+00> : vector<8x32xf32>
    %29 = tpu.matmul %26, %28, %cst_18 {dimension_numbers = #tpu.dot_dimension_numbers<[1], [0], [0], [1], [0, 0, 1, 1], [], []>} : vector<8x8xf32>, vector<8x32xf32>, vector<8x32xf32> -> vector<8x32xf32>
    %c0_i32_19 = arith.constant 0 : i32
    %30 = arith.cmpi eq, %arg2, %c0_i32_19 : i32
    %31 = arith.extui %30 : i1 to i32
    %c0_i32_20 = arith.constant 0 : i32
    %32 = arith.cmpi ne, %31, %c0_i32_20 : i32
    scf.if %32 {
      %cst_26 = arith.constant 0.000000e+00 : f32
      %39 = vector.broadcast %cst_26 : f32 to vector<8x32xf32>
      %c0_27 = arith.constant 0 : index
      %c0_28 = arith.constant 0 : index
      %40 = vector.load %arg15[%c0_27, %c0_28] : memref<8x32xf32, #tpu.memory_space<vmem>>, vector<8x32xf32>
      tpu.vector_store %arg15[%c0_27, %c0_28], %39 {strides = array<i32>} : memref<8x32xf32, #tpu.memory_space<vmem>>, vector<8x32xf32>,
    } else {
    }
    %c0_21 = arith.constant 0 : index
    %c0_22 = arith.constant 0 : index
    %33 = vector.load %arg15[%c0_21, %c0_22] : memref<8x32xf32, #tpu.memory_space<vmem>>, vector<8x32xf32>
    %34 = arith.addf %33, %29 : vector<8x32xf32>
    %c0_23 = arith.constant 0 : index
    %c0_24 = arith.constant 0 : index
    %35 = vector.load %arg15[%c0_23, %c0_24] : memref<8x32xf32, #tpu.memory_space<vmem>>, vector<8x32xf32>
    tpu.vector_store %arg15[%c0_23, %c0_24], %34 {strides = array<i32>} : memref<8x32xf32, #tpu.memory_space<vmem>>, vector<8x32xf32>,
    %c3_i32 = arith.constant 3 : i32
    %36 = arith.cmpi eq, %arg2, %c3_i32 : i32
    %37 = arith.extui %36 : i1 to i32
    %c0_i32_25 = arith.constant 0 : i32
    %38 = arith.cmpi ne, %37, %c0_i32_25 : i32
    scf.if %38 {
      %c0_26 = arith.constant 0 : index
      %c0_27 = arith.constant 0 : index
      %39 = vector.load %arg15[%c0_26, %c0_27] : memref<8x32xf32, #tpu.memory_space<vmem>>, vector<8x32xf32>
      %c0_28 = arith.constant 0 : index
      %c0_29 = arith.constant 0 : index
      %40 = vector.load %arg11[%c0_28, %c0_29] : memref<1x32xf32, #tpu.memory_space<vmem>>, vector<1x32xf32>
      %41 = vector.broadcast %40 : vector<1x32xf32> to vector<8x32xf32>
      %42 = arith.addf %39, %41 : vector<8x32xf32>
      %c0_30 = arith.constant 0 : index
      %c0_31 = arith.constant 0 : index
      %c0_32 = arith.constant 0 : index
      %43 = vector.load %arg12[%c0_30, %c0_31, %c0_32] : memref<1x8x32xf32, #tpu.memory_space<vmem>>, vector<1x8x32xf32>
      %44 = vector.shape_cast %43 : vector<1x8x32xf32> to vector<8x32xf32>
      %45 = vector.shape_cast %42 : vector<8x32xf32> to vector<1x8x32xf32>
      tpu.vector_store %arg12[%c0_30, %c0_31, %c0_32], %45 {strides = array<i32>} : memref<1x8x32xf32, #tpu.memory_space<vmem>>, vector<1x8x32xf32>,
    } else {
    }
    return
  }
  func.func @transform_0(%arg0: i32, %arg1: i32, %arg2: i32) -> (i32, i32, i32) {
    %c0_i32 = arith.constant 0 : i32
    %c0_i32_0 = arith.constant 0 : i32
    %c0_i32_1 = arith.constant 0 : i32
    return %arg0, %c0_i32, %c0_i32_0 : i32, i32, i32
  }
  func.func @transform_1(%arg0: i32, %arg1: i32, %arg2: i32) -> (i32, i32, i32) {
    %c0_i32 = arith.constant 0 : i32
    %c0_i32_0 = arith.constant 0 : i32
    %c0_i32_1 = arith.constant 0 : i32
    return %arg2, %c0_i32, %c0_i32_0 : i32, i32, i32
  }
  func.func @transform_2(%arg0: i32, %arg1: i32, %arg2: i32) -> (i32, i32, i32) {
    %c0_i32 = arith.constant 0 : i32
    %c0_i32_0 = arith.constant 0 : i32
    %c0_i32_1 = arith.constant 0 : i32
    return %arg2, %c0_i32, %c0_i32_0 : i32, i32, i32
  }
  func.func @transform_3(%arg0: i32, %arg1: i32, %arg2: i32) -> (i32, i32, i32) {
    %c0_i32 = arith.constant 0 : i32
    %c0_i32_0 = arith.constant 0 : i32
    %c0_i32_1 = arith.constant 0 : i32
    %c0_i32_2 = arith.constant 0 : i32
    return %c0_i32, %c0_i32_0, %c0_i32_1 : i32, i32, i32
  }
  func.func @transform_4(%arg0: i32, %arg1: i32, %arg2: i32) -> (i32, i32, i32) {
    %c0_i32 = arith.constant 0 : i32
    %c0_i32_0 = arith.constant 0 : i32
    %c0_i32_1 = arith.constant 0 : i32
    %c0_i32_2 = arith.constant 0 : i32
    return %c0_i32, %c0_i32_0, %c0_i32_1 : i32, i32, i32
  }
  func.func @transform_5(%arg0: i32, %arg1: i32, %arg2: i32) -> (i32, i32, i32) {
    %c0_i32 = arith.constant 0 : i32
    %c0_i32_0 = arith.constant 0 : i32
    %c0_i32_1 = arith.constant 0 : i32
    %c0_i32_2 = arith.constant 0 : i32
    return %c0_i32, %c0_i32_0, %c0_i32_1 : i32, i32, i32
  }
  func.func @transform_6(%arg0: i32, %arg1: i32, %arg2: i32) -> (i32, i32, i32) {
    %c0_i32 = arith.constant 0 : i32
    %c0_i32_0 = arith.constant 0 : i32
    %c0_i32_1 = arith.constant 0 : i32
    %c0_i32_2 = arith.constant 0 : i32
    return %c0_i32, %c0_i32_0, %c0_i32_1 : i32, i32, i32
  }
  func.func @transform_7(%arg0: i32, %arg1: i32, %arg2: i32) -> (i32, i32, i32) {
    %c0_i32 = arith.constant 0 : i32
    %c0_i32_0 = arith.constant 0 : i32
    %c0_i32_1 = arith.constant 0 : i32
    return %arg2, %c0_i32, %c0_i32_0 : i32, i32, i32
  }
  func.func @transform_8(%arg0: i32, %arg1: i32, %arg2: i32) -> (i32, i32) {
    %c0_i32 = arith.constant 0 : i32
    %c0_i32_0 = arith.constant 0 : i32
    %c0_i32_1 = arith.constant 0 : i32
    return %c0_i32, %c0_i32_0 : i32, i32
  }
  func.func @transform_9(%arg0: i32, %arg1: i32, %arg2: i32) -> (i32, i32, i32) {
    %c0_i32 = arith.constant 0 : i32
    %c0_i32_0 = arith.constant 0 : i32
    return %arg0, %arg1, %c0_i32 : i32, i32, i32
  }
}

</mosaic_0001>

<bundles_post_ra>
// kernel: tpu_custom_call.1
= control target key start
LH: loop header
LB: loop body
LE: loop exit
PB: predicated region body
PF: predicated region fallthrough
CT: control target
= control target key end

     0   :  { %s2609_s0 = inlined_call_operand.vmem [shape: f32[2,8,32], index: 0, kind: input, shape index: {}]   ;;  %s2610_s1 = inlined_call_operand.vmem [shape: f32[4,32,8], index: 1, kind: input, shape index: {}]   ;;  %s2611_s2 = inlined_call_operand.vmem [shape: f32[4,1,8], index: 2, kind: input, shape index: {}]   ;;  %s2612_s3 = inlined_call_operand.vmem [shape: f32[4,32,8], index: 3, kind: input, shape index: {}]   ;;  %s2613_s4 = inlined_call_operand.vmem [shape: f32[4,1,8], index: 4, kind: input, shape index: {}]   ;;  %s2614_s5 = inlined_call_operand.vmem [shape: f32[4,32,8], index: 5, kind: input, shape index: {}]   ;;  %s2615_s6 = inlined_call_operand.vmem [shape: f32[4,1,8], index: 6, kind: input, shape index: {}]   ;;  %s2616_s7 = inlined_call_operand.vmem [shape: f32[4,8,32], index: 7, kind: input, shape index: {}]   ;;  %s2617_s8 = inlined_call_operand.vmem [shape: f32[1,32], index: 8, kind: input, shape index: {}]   ;;  %s2618_s9 = inlined_call_operand.hbm [shape: f32[2,8,32], index: 9, kind: output, shape index: {}]  }
   0x1   :  { %2629 = sst [smem:[#allocation17_spill]] %s2618_s9 }
   0x2   :  { %14 = vsyncpa [#allocation6], 0 }
   0x3   :  { %16 = vsyncpa [#allocation6 + $0x1], 0  ;;  %s2211_s30 = smov 0   ;;  %s2213_s10 = smov 0  }
   0x4   :  { %s2215_s11 = smov 0   ;;  %s2217_s12 = smov 0  }
   0x5   :  { %s2219_s13 = smov 0   ;;  %s2221_s14 = smov 0  }
   0x6   :  { %s2223_s15 = smov 0   ;;  %s2225_s16 = smov 0  }
   0x7 LB: > { %2630 = sst [smem:[#allocation8_spill]] %s2105_s30  ;;  %s1612_s17 = sadd.s32 4294967295, %s2133_s16   ;;  %s2133_s16 = sphi %s2225_s16, %s22_s16   ;;  %s2129_s15 = sphi %s2223_s15, %s2658_s15   ;;  %s2125_s14 = sphi %s2221_s14, %s2654_s14   ;;  %s2121_s13 = sphi %s2219_s13, %s2653_s13   ;;  %s2117_s12 = sphi %s2217_s12, %s2652_s12   ;;  %s2113_s11 = sphi %s2215_s11, %s2651_s11   ;;  %s2109_s10 = sphi %s2213_s10, %s2657_s10   ;;  %s2105_s30 = sphi %s2211_s30, %s2656_s30  }
   0x8   : > { %2631 = sst [smem:[#allocation9_spill]] %s2113_s11  ;;  %s1613_s18 = sadd.s32 4294967294, %s2133_s16  }
   0x9   : > { %2632 = sst [smem:[#allocation10_spill]] %s2125_s14  ;;  %s34_s19 = sadd.s32 1, %s2125_s14 }
   0xa   : > { %2633 = sst [smem:[#allocation11_spill]] %s2129_s15  ;;  %p35_p0 = scmp.ge.s32.totalorder %s34_s19, 4 }
   0xb   : > { %2634 = sst [smem:[#allocation12_spill]] %s2133_s16  ;;  %s41_s20 = sadd.s32 1, %s2129_s15 }
   0xc   : > { %p269_p1 = scmp.ne.s32.totalorder %s2113_s11, %s2109_s10  ;;  %p270_p2 = scmp.eq.s32.totalorder %s1612_s17, 7 }
   0xd   : > { %s2660_s19 = smov (%p35_p0, %s34_s19), 0  ;;  %s2662_s20 = smov (!%p35_p0, %s41_s20), %s2129_s15 }
   0xe   : > { %2635 = sst [smem:[#allocation13_spill]] %s2660_s19  ;;  %p2260_p3 = por %p270_p2, %p269_p1 }
   0xf   : > { %p275_p4 = scmp.ne.s32.totalorder %s2109_s10, %s2105_s30  ;;  %p43_p5 = scmp.ge.s32.totalorder %s2662_s20, 2 }
  0x10   : > { %p276_p6 = scmp.eq.s32.totalorder %s1613_s18, 7  ;;  %p1616_p7 = scmp.ge.s32.totalorder %s2133_s16, 1 }
  0x11   : > { %p337_p8 = scmp.lt.s32.totalorder %s2133_s16, 9  ;;  %s2664_s20 = smov (%p43_p5, %s2662_s20), 0 }
  0x12   : > { %2637 = sst [smem:[#allocation14_spill]] %s2664_s20  ;;  %p2270_p9 = por %p276_p6, %p275_p4 }
  0x13   : > { %p338_p10 = pnand %p1616_p7, %p337_p8  ;;  %s254_s23 = ssub.s32 %s2129_s15, %s2664_s20 }
  0x14   : > { %s2638_s22 = scalar_select %p2270_p9, 1, 0 }
  0x15   : > { %s259_s24 = sadd.s32 1, %s2113_s11  ;;  %p257_p11 = scmp.eq.s32.totalorder %s254_s23, 0 }
  0x16   : > { %2639 = sst [smem:[#allocation15_spill]] %s2638_s22  ;;  %341 = sbr.rel (%p338_p10) target bundleno = 1354 (0x54a), region = 56 }
  0x17   : > { %s2278_s25 = scalar_select %p257_p11, %s2113_s11, %s259_s24  }
  0x18   : > { %s2621_s26 = sand.u32 (!%p338_p10), 1, %s2109_s10   ;;  %p384_p12 = scmp.lt.s32.totalorder (!%p338_p10), %s2121_s13, 1 }
  0x19   : > { %2640 = sst [smem:[#allocation16_spill]] %s2278_s25  ;;  %s2284_s27 = sshll.u32 (!%p338_p10), %s2621_s26, 3 }
  0x1a   : > { %p388_p13 = scmp.lt.s32.totalorder (!%p338_p10), %s2117_s12, 3  ;;  %p401_p0 = scmp.eq.s32.totalorder (!%p338_p10), %s2117_s12, 0 }
  0x1b   : > { %s383_s9 = scalar_lea.vmem (!%p338_p10), [#allocation5], %s2284_s27 }
  0x1d   : > { %s385_s28 = scalar_select %p384_p12, %s2121_s13, 1 }
  0x1e   : > { %s2290_s29 = scalar_select %p388_p13, %s2117_s12, 3 }
  0x1f   : > { %s1618_s17 = sshll.u32 %s385_s28, 3  ;;  %405 = sbr.rel (!%p401_p0) target bundleno = 281 (0x119), region = 60  ;;  %v407_v0 = vld [vmem:[%s2612_s3] sm:$0xff] (%p401_p0)  ;;  %v408_v1 = vld [vmem:[%s2612_s3 + $0x8] sm:$0xff] (%p401_p0)  ;;  %v2151_v3 = vmov (%p401_p0), 0.0|0.0   ;;  %v409_v6 = vld [vmem:[%s2612_s3 + $0x10] sm:$0xff] (%p401_p0) }
  0x20   : > { %s2295_s24 = scalar_lea.vmem %s2609_s0, %s1618_s17  ;;  %s1684_s20 = sshll.u32 %s2290_s29, 5  ;;  %v494_v2 = vld [vmem:[%s2614_s5] sm:$0xff] (%p401_p0)  ;;  %1851 = vmatprep.subr.bf16.mxu0 (%p401_p0), %v2151_v3  ;;  %1857 = vmatprep.subr.bf16.mxu1 (%p401_p0), %v2151_v3  ;;  %v1852_v4 = vpack.c.bf16 (%p401_p0), %v408_v1, %v407_v0  ;;  %v495_v5 = vld [vmem:[%s2614_s5 + $0x8] sm:$0xff] (%p401_p0)  ;;  %v410_v7 = vld [vmem:[%s2612_s3 + $0x18] sm:$0xff] (%p401_p0)  ;;  %vm2152_vm0 = vmmov (%p401_p0), 0   ;;  %v2153_v11 = vmov (%p401_p0), 0.0  }
  0x21   : > { %s2301_s26 = scalar_lea.vmem %s2610_s1, %s1684_s20  ;;  %s395_s11 = scalar_lea.vmem %s2611_s2, %s2290_s29  ;;  %v1858_v8 = vpack.c.bf16 (%p401_p0), %v495_v5, %v494_v2  ;;  %v496_v9 = vld [vmem:[%s2614_s5 + $0x10] sm:$0xff] (%p401_p0)  ;;  %v497_v10 = vld [vmem:[%s2614_s5 + $0x18] sm:$0xff] (%p401_p0)  ;;  %1745 = vmatprep.mubr.msk.f32.mxu0 (%p401_p0), %vm2152_vm0, %v2153_v11  ;;  %1756 = vmatprep.mubr.msk.f32.mxu1 (%p401_p0), %vm2152_vm0, %v2153_v11  ;;  %v1855_v12 = vpack.c.bf16 (%p401_p0), %v410_v7, %v409_v6  ;;  %v1627_v14 = vld [vmem:[%s2612_s3 + $0x20] sm:$0xff] (%p401_p0)  ;;  %vm418_vm1 = vcmask (%p401_p0), 261120   ;;  %vm492_vm2 = vcmask (%p401_p0), 64512  }
  0x22   : > { %s1621_s22 = sshll.u32 %s2290_s29, 3  ;;  %1853 = vmatpush3.bf16.msra.mxu0 (%p401_p0), %v1852_v4  ;;  %v1861_v13 = vpack.c.bf16 (%p401_p0), %v497_v10, %v496_v9  ;;  %v1628_v15 = vld [vmem:[%s2612_s3 + $0x28] sm:$0xff] (%p401_p0)  ;;  %v1634_v16 = vld [vmem:[%s2614_s5 + $0x20] sm:$0xff] (%p401_p0)  ;;  %v1629_v21 = vld [vmem:[%s2612_s3 + $0x30] sm:$0xff] (%p401_p0) }
  0x23   : > { %s2311_s28 = scalar_lea.vmem %s2616_s7, %s1621_s22  ;;  %1859 = vmatpush3.bf16.msra.mxu1 (%p401_p0), %v1858_v8  ;;  %1854 = vmatprep.subr.bf16.mxu0 (%p401_p0), %v2151_v3  ;;  %v1635_v17 = vld [vmem:[%s2614_s5 + $0x28] sm:$0xff] (%p401_p0)  ;;  %v2359_v18 = vld [vmem:[%s2295_s24] sm:$0xff] (%p401_p0)  ;;  %v1864_v19 = vpack.c.bf16 (%p401_p0), %v1628_v15, %v1627_v14  ;;  %v1630_v22 = vld [vmem:[%s2612_s3 + $0x38] sm:$0xff] (%p401_p0) }
  0x24   : > { %1860 = vmatprep.subr.bf16.mxu1 (%p401_p0), %v2151_v3  ;;  %v1870_v20 = vpack.c.bf16 (%p401_p0), %v1635_v17, %v1634_v16  ;;  %v1636_v23 = vld [vmem:[%s2614_s5 + $0x30] sm:$0xff] (%p401_p0)  ;;  %v1637_v24 = vld [vmem:[%s2614_s5 + $0x38] sm:$0xff] (%p401_p0)  ;;  %v1867_v25 = vpack.c.bf16 (%p401_p0), %v1630_v22, %v1629_v21  ;;  %v1641_v27 = vld [vmem:[%s2612_s3 + $0x40] sm:$0xff] (%p401_p0) }
  0x25   : > { %v1873_v26 = vpack.c.bf16 (%p401_p0), %v1637_v24, %v1636_v23  ;;  %v1642_v28 = vld [vmem:[%s2612_s3 + $0x48] sm:$0xff] (%p401_p0)  ;;  %v1648_v29 = vld [vmem:[%s2614_s5 + $0x40] sm:$0xff] (%p401_p0)  ;;  %v1643_v33 = vld [vmem:[%s2612_s3 + $0x50] sm:$0xff] (%p401_p0) }
  0x26   : > { %1856 = vmatpush3.bf16.msra.mxu0 %v1855_v12  ;;  %v1649_v30 = vld [vmem:[%s2614_s5 + $0x48] sm:$0xff]  ;;  %v1876_v31 = vpack.c.bf16 %v1642_v28, %v1641_v27  ;;  %v1644_v34 = vld [vmem:[%s2612_s3 + $0x58] sm:$0xff]  ;;  %v1650_v35 = vld [vmem:[%s2614_s5 + $0x50] sm:$0xff] }
  0x27   : > { %1862 = vmatpush3.bf16.msra.mxu1 %v1861_v13  ;;  %1863 = vmatprep.subr.bf16.mxu0 %v2151_v3  ;;  %v1882_v32 = vpack.c.bf16 %v1649_v30, %v1648_v29  ;;  %v1651_v36 = vld [vmem:[%s2614_s5 + $0x58] sm:$0xff]  ;;  %v1879_v37 = vpack.c.bf16 %v1644_v34, %v1643_v33  ;;  %v1655_v39 = vld [vmem:[%s2612_s3 + $0x60] sm:$0xff]  ;;  %v1656_v40 = vld [vmem:[%s2612_s3 + $0x68] sm:$0xff] }
  0x28   : > { %1869 = vmatprep.subr.bf16.mxu1 %v2151_v3  ;;  %v1885_v38 = vpack.c.bf16 %v1651_v36, %v1650_v35  ;;  %v1662_v41 = vld [vmem:[%s2614_s5 + $0x60] sm:$0xff]  ;;  %v1663_v42 = vld [vmem:[%s2614_s5 + $0x68] sm:$0xff]  ;;  %v1888_v43 = vpack.c.bf16 %v1656_v40, %v1655_v39  ;;  %v1657_v45 = vld [vmem:[%s2612_s3 + $0x70] sm:$0xff] }
  0x29   : > { %1746 = vmatmul.mubr.msk.f32.vlgmr.msra.gmra.mrb[0].mxu0 %vm418_vm1, %v2359_v18  ;;  %v1894_v44 = vpack.c.bf16 %v1663_v42, %v1662_v41  ;;  %v1658_v46 = vld [vmem:[%s2612_s3 + $0x78] sm:$0xff]  ;;  %v1664_v47 = vld [vmem:[%s2614_s5 + $0x70] sm:$0xff]  ;;  %v1623_v51 = vld [vmem:[%s2613_s4] ss:$0 sm:$0xff] }
  0x2a   : > { %1757 = vmatmul.mubr.msk.f32.vlgmr.msra.gmra.mrb[0].mxu1 %vm418_vm1, %v2359_v18  ;;  %1865 = vmatpush3.bf16.msra.mxu0 %v1864_v19  ;;  %v1665_v48 = vld [vmem:[%s2614_s5 + $0x78] sm:$0xff]  ;;  %v1891_v49 = vpack.c.bf16 %v1658_v46, %v1657_v45  ;;  %v1625_v52 = vld [vmem:[%s2615_s6] ss:$0 sm:$0xff]  ;;  %v1632_v59 = vld [vmem:[%s2613_s4 + $0x1] ss:$0 sm:$0xff] }
  0x2b   : > { %1871 = vmatpush3.bf16.msra.mxu1 %v1870_v20  ;;  %1866 = vmatprep.subr.bf16.mxu0 %v2151_v3  ;;  %v1897_v50 = vpack.c.bf16 %v1665_v48, %v1664_v47  ;;  %v1639_v60 = vld [vmem:[%s2615_s6 + $0x1] ss:$0 sm:$0xff]  ;;  %v1653_v4 = vld [vmem:[%s2615_s6 + $0x2] ss:$0 sm:$0xff]  ;;  %v1667_v12 = vld [vmem:[%s2615_s6 + $0x3] ss:$0 sm:$0xff] }
  0x2c   : > { %1872 = vmatprep.subr.bf16.mxu1 %v2151_v3  ;;  %1767 = vmatprep.mubr.msk.f32.mxu0 %vm2152_vm0, %v2153_v11 }
  0x2d   : > { %1778 = vmatprep.mubr.msk.f32.mxu1 %vm2152_vm0, %v2153_v11 }
  0x2e   : > { %1868 = vmatpush3.bf16.msra.mxu0 %v1867_v25 }
  0x2f   : > { %1874 = vmatpush3.bf16.msra.mxu1 %v1873_v26  ;;  %1875 = vmatprep.subr.bf16.mxu0 %v2151_v3 }
  0x30   : > { %1881 = vmatprep.subr.bf16.mxu1 %v2151_v3 }
  0x31   : > { %1768 = vmatmul.mubr.msk.f32.vlgmr.msra.gmra.mrb[2].mxu0 %vm418_vm1, %v2359_v18 }
  0x32   : > { %1779 = vmatmul.mubr.msk.f32.vlgmr.msra.gmra.mrb[2].mxu1 %vm418_vm1, %v2359_v18  ;;  %1877 = vmatpush3.bf16.msra.mxu0 %v1876_v31 }
  0x33   : > { %1883 = vmatpush3.bf16.msra.mxu1 %v1882_v32  ;;  %1878 = vmatprep.subr.bf16.mxu0 %v2151_v3 }
  0x34   : > { %1884 = vmatprep.subr.bf16.mxu1 %v2151_v3  ;;  %1789 = vmatprep.mubr.msk.f32.mxu0 %vm2152_vm0, %v2153_v11 }
  0x35   : > { %1800 = vmatprep.mubr.msk.f32.mxu1 %vm2152_vm0, %v2153_v11 }
  0x36   : > { %1880 = vmatpush3.bf16.msra.mxu0 %v1879_v37 }
  0x37   : > { %1886 = vmatpush3.bf16.msra.mxu1 %v1885_v38  ;;  %1887 = vmatprep.subr.bf16.mxu0 %v2151_v3 }
  0x38   : > { %1893 = vmatprep.subr.bf16.mxu1 %v2151_v3 }
  0x39   : > { %1790 = vmatmul.mubr.msk.f32.vlgmr.msra.gmra.mrb[4].mxu0 %vm418_vm1, %v2359_v18 }
  0x3a   : > { %1801 = vmatmul.mubr.msk.f32.vlgmr.msra.gmra.mrb[4].mxu1 %vm418_vm1, %v2359_v18  ;;  %1889 = vmatpush3.bf16.msra.mxu0 %v1888_v43 }
  0x3b   : > { %1895 = vmatpush3.bf16.msra.mxu1 %v1894_v44  ;;  %1890 = vmatprep.subr.bf16.mxu0 %v2151_v3 }
  0x3c   : > { %1896 = vmatprep.subr.bf16.mxu1 %v2151_v3  ;;  %1811 = vmatprep.mubr.msk.f32.mxu0 %vm2152_vm0, %v2153_v11  ;;  %v1646_v3 = vld [vmem:[%s2613_s4 + $0x2] ss:$0 sm:$0xff] }
  0x3d   : > { %1822 = vmatprep.mubr.msk.f32.mxu1 %vm2152_vm0, %v2153_v11  ;;  %v1660_v11 = vld [vmem:[%s2613_s4 + $0x3] ss:$0 sm:$0xff] }
  0x3e   : > { %1892 = vmatpush3.bf16.msra.mxu0 %v1891_v49 }
  0x3f   : > { %1898 = vmatpush3.bf16.msra.mxu1 %v1897_v50 }
  0x41   : > { %1812 = vmatmul.mubr.msk.f32.vlgmr.msra.gmra.mrb[6].mxu0 %vm418_vm1, %v2359_v18 }
  0x42   : > { %1823 = vmatmul.mubr.msk.f32.vlgmr.msra.gmra.mrb[6].mxu1 %vm418_vm1, %v2359_v18 }
  0xfc   : > { %v488_v53 = vpop.f32.mrb[0].mxu0 }
  0xfd   : > { %v489_v54 = vadd.f32 %v1623_v51, %v488_v53  ;;  %v571_v55 = vpop.f32.mrb[0].mxu1  ;;  %v1747_v56 = vpop.f32.mrb[1].mxu0 }
  0xfe   : > { %v572_v57 = vadd.f32 %v1625_v52, %v571_v55  ;;  %v1758_v58 = vpop.f32.mrb[1].mxu1 }
  0xff   : > { %493 = vst.msk [vmem:[#allocation2] sm:$0xff] %vm492_vm2, %v489_v54 }
 0x100   : > { %575 = vst.msk [vmem:[#allocation3] sm:$0xff] %vm492_vm2, %v572_v57 }
 0x104   : > { %v655_v61 = vpop.f32.mrb[2].mxu0 }
 0x105   : > { %v656_v62 = vadd.f32 %v1632_v59, %v655_v61  ;;  %v740_v63 = vpop.f32.mrb[2].mxu1  ;;  %v1769_v0 = vpop.f32.mrb[3].mxu0 }
 0x106   : > { %v741_v1 = vadd.f32 %v1639_v60, %v740_v63  ;;  %v1780_v2 = vpop.f32.mrb[3].mxu1 }
 0x107   : > { %660 = vst.msk [vmem:[#allocation2 + $0x8] sm:$0xff] %vm492_vm2, %v656_v62 }
 0x108   : > { %745 = vst.msk [vmem:[#allocation3 + $0x8] sm:$0xff] %vm492_vm2, %v741_v1 }
 0x10c   : > { %v825_v5 = vpop.f32.mrb[4].mxu0 }
 0x10d   : > { %v826_v6 = vadd.f32 %v1646_v3, %v825_v5  ;;  %v910_v7 = vpop.f32.mrb[4].mxu1  ;;  %v1791_v8 = vpop.f32.mrb[5].mxu0 }
 0x10e   : > { %v911_v9 = vadd.f32 %v1653_v4, %v910_v7  ;;  %v1802_v10 = vpop.f32.mrb[5].mxu1 }
 0x10f   : > { %830 = vst.msk [vmem:[#allocation2 + $0x10] sm:$0xff] %vm492_vm2, %v826_v6 }
 0x110   : > { %915 = vst.msk [vmem:[#allocation3 + $0x10] sm:$0xff] %vm492_vm2, %v911_v9 }
 0x114   : > { %v995_v13 = vpop.f32.mrb[6].mxu0 }
 0x115   : > { %v996_v14 = vadd.f32 %v1660_v11, %v995_v13  ;;  %v1080_v15 = vpop.f32.mrb[6].mxu1  ;;  %v1813_v16 = vpop.f32.mrb[7].mxu0 }
 0x116   : > { %v1081_v17 = vadd.f32 %v1667_v12, %v1080_v15  ;;  %v1824_v18 = vpop.f32.mrb[7].mxu1 }
 0x117   : > { %1000 = vst.msk [vmem:[#allocation2 + $0x18] sm:$0xff] %vm492_vm2, %v996_v14 }
 0x118   : > { %1085 = vst.msk [vmem:[#allocation3 + $0x18] sm:$0xff] %vm492_vm2, %v1081_v17 }
 0x119 PF: > { %v1089_v19 = vld [vmem:[%s2301_s26] sm:$0xff]  ;;  %v1090_v20 = vld [vmem:[%s2301_s26 + $0x8] sm:$0xff]  ;;  %v1091_v21 = vld [vmem:[%s2301_s26 + $0x10] sm:$0xff]  ;;  %v2154_v22 = vmov 0.0|0.0   ;;  %vm2155_vm3 = vmmov 0   ;;  %v2156_v25 = vmov 0.0  }
 0x11a   : > { %1899 = vmatprep.subr.bf16.mxu0 %v2154_v22  ;;  %v1900_v23 = vpack.c.bf16 %v1090_v20, %v1089_v19  ;;  %v1092_v24 = vld [vmem:[%s2301_s26 + $0x18] sm:$0xff]  ;;  %1833 = vmatprep.mubr.msk.f32.mxu0 %vm2155_vm3, %v2156_v25  ;;  %v1088_v27 = vld [vmem:[%s2295_s24] sm:$0xff]  ;;  %vm1100_vm4 = vcmask 261120   ;;  %v2508_v32 = vmov 0.0   ;;  %v2510_v33 = vmov 0.0   ;;  %s2514_s26 = smov 0  }
 0x11b   : > { %v1903_v26 = vpack.c.bf16 %v1092_v24, %v1091_v21  ;;  %v1669_v28 = vld [vmem:[%s395_s11] ss:$0 sm:$0xff]  ;;  %v2512_v34 = vmov -1e+30  }
 0x11c   : > { %1901 = vmatpush3.bf16.msra.mxu0 %v1900_v23 }
 0x11d   : > { %1902 = vmatprep.subr.bf16.mxu0 %v2154_v22 }
 0x120   : > { %1904 = vmatpush3.bf16.msra.mxu0 %v1903_v26 }
 0x123   : > { %1834 = vmatmul.mubr.msk.f32.vlgmr.msra.gmra.mrb[0].mxu0 %vm1100_vm4, %v1088_v27 }
 0x1f6   : > { %v1170_v29 = vpop.f32.mrb[0].mxu0 }
 0x1f7   : > { %v2506_v30 = vadd.f32 %v1669_v28, %v1170_v29  ;;  %v1835_v31 = vpop.f32.mrb[1].mxu0 }
 0x1f8 LB: >> { %s1672_s11 = sshll.u32 %s2117_s12, 3  ;;  %v2157_v35 = vmov 0.0   ;;  %vm2158_vm5 = vmmov 0   ;;  %s1671_s29 = sshll.u32 %s2149_s26, 3  ;;  %vm1191_vm6 = vcmask 64512   ;;  %v1268_v37 = vlaneseq  ;;  %s2149_s26 = sphi %s2514_s26, %s1178_s26   ;;  %v2145_v34 = vphi %v2512_v34, %v2643_v34   ;;  %v2141_v33 = vphi %v2510_v33, %v2642_v33   ;;  %v2137_v32 = vphi %v2508_v32, %v2641_v32  }
 0x1f9   : >> { %1836 = vmatprep.subr.mxu0 %v2157_v35  ;;  %1838 = vmatprep.mubr.msk.f32.mxu0 %vm2158_vm5, %v2157_v35  ;;  %s1186_s24 = sadd.s32 %s1672_s11, %s1671_s29  ;;  %v1274_v39 = vstv %s1671_s29  ;;  %s1178_s26 = sadd.s32 1, %s2149_s26  }
 0x1fa   : >> { %1841 = vmatprep.subr.mxu1 %v2157_v35  ;;  %1843 = vmatprep.mubr.msk.f32.mxu1 %vm2158_vm5, %v2157_v35  ;;  %s1187_s20 = scalar_lea.vmem [#allocation2], %s1186_s24  ;;  %v1273_v38 = vand.u32 127, %v1268_v37  ;;  %v1269_v40 = vshrl.u32 %v1268_v37, 7  ;;  %s1189_s30 = scalar_lea.vmem [#allocation3], %s1186_s24 }
 0x1fb   : >> { %v1188_v36 = vld [vmem:[%s1187_s20] sm:$0xff]  ;;  %p1177_p1 = scmp.ge.s32.totalorder %s1178_s26, 1 }
 0x1fc   : >> { %1837 = vmatpush3.xpose.msk.msra.mxu0 %vm1191_vm6, %v1188_v36  ;;  %v1275_v41 = vadd.s32 %v1274_v39, %v1273_v38  ;;  %v1190_v46 = vld [vmem:[%s1189_s30] sm:$0xff]  ;;  %p1677_p2 = scmp.ne.s32.totalorder (%p1177_p1), %s2117_s12, 0 }
 0x1fd   : >> { %1842 = vmatpush3.msra.mxu1 %v1190_v46  ;;  %1846 = vmatprep.subr.mxu0 (%p1177_p1), %v2156_v25  ;;  %v1370_v63 = vld [vmem:[%s2311_s28] sm:$0xff] (%p1177_p1) }
 0x1fe   : >> { %vm1276_vm7 = vcmp.le.s32.totalorder %v1275_v41, %v1269_v40 }
 0x1ff   : >> { %1839 = vmatmul.mubr.msk.f32.vlgmr.msra.gmra.mrb[0].mxu0 %vm1191_vm6, %v2506_v30 }
 0x200   : > { %1848 = vmatprep.mubr.msk.f32.mxu0 (%p1177_p1), %vm2155_vm3, %v2156_v25  ;;  %1847 = vmatpush3.msra.mxu0 (%p1177_p1), %v1370_v63 }
 0x2d2   : >> { %v1264_v42 = vpop.f32.mrb[0].mxu0 }
 0x2d3   : >> { %v1277_v43 = vsel %vm1276_vm7, %v1264_v42, -1e+30  ;;  %v1840_v44 = vpop.f32.mrb[1].mxu0 }
 0x2d4   : >> { %v1278_v45 = vsel %vm1191_vm6, %v1277_v43, -inf }
 0x2d5   : >> { %1279 = vmax.xlane.f32.xlu0 %v1278_v45 }
 0x362   : >> { %v1280_v47 = vpop.xlane.xlu0 %1279 }
 0x363   : >> { %v1281_v48 = vmax.f32 %v2145_v34, %v1280_v47  }
 0x365   : >> { %v1282_v49 = vsub.f32 %v2145_v34, %v1281_v48  ;;  %v1285_v50 = vsub.f32 %v1277_v43, %v1281_v48  ;;  %v2643_v34 = vmov %v1281_v48 }
 0x367   : >> { %v1286_v51 = vmul.f32 1.442695, %v1285_v50  ;;  %v1283_v54 = vmul.f32 1.442695, %v1282_v49 }
 0x369   : >> { %2017 = vpow2.f32 %v1286_v51 }
 0x36a   : >> { %2019 = vpow2.f32 %v1283_v54 }
 0x373   : >> { %v2018_v52 = vpop.eup %2017 }
 0x374   : >> { %1844 = vmatmul.mubr.msk.f32.vlgmr.msra.gmra.mrb[0].mxu1 %vm1191_vm6, %v2018_v52  ;;  %v1289_v53 = vsel %vm1191_vm6, %v2018_v52, 0.0  ;;  %v2020_v55 = vpop.eup %2019 }
 0x375   : >> { %1290 = vadd.xlane.f32.xlu0 %v1289_v53  ;;  %v1288_v56 = vmul.f32 %v2141_v33, %v2020_v55  ;;  %v1293_v59 = vmul.f32 %v2137_v32, %v2020_v55 }
 0x402   : >> { %v1291_v57 = vpop.xlane.xlu0 %1290 }
 0x403   : >> { %v1292_v58 = vadd.f32 %v1291_v57, %v1288_v56  }
 0x405   : >> { %v2642_v33 = vmov %v1292_v58  ;;  %2021 = vrcp.f32 (%p1177_p1), %v1292_v58 }
 0x40f   : > { %v2022_v0 = vpop.eup (%p1177_p1), %2021 }
 0x444   : > { %1180 = sbr.rel (!%p1177_p1) target bundleno = 504 (0x1f8), region = 140 }
 0x447   : >> { %v1363_v60 = vpop.f32.mrb[0].mxu1 }
 0x448   : >> { %v1367_v61 = vadd.f32 %v1363_v60, %v1293_v59   ;;  %v1845_v62 = vpop.f32.mrb[1].mxu1 }
 0x44a   : >> { %v2641_v32 = vmov %v1367_v61  ;;  %v1369_v1 = vmul.f32 (%p1177_p1), %v2022_v0, %v1367_v61 }
 0x44b   : > { %v2159_v4 = vmov (!%p1677_p2), 0.0  }
 0x44c   : > { %1849 = vmatmul.mubr.msk.f32.vlgmr.msra.gmra.mrb[0].mxu0 %vm1191_vm6, %v1369_v1  ;;  %1448 = vst.msk [vmem:[#allocation4] sm:$0xff] (!%p1677_p2), %vm1100_vm4, %v2159_v4 }
 0x51a   : > { %1447 = sbr.rel (%p1677_p2) target bundleno = 1313 (0x521), region = 71 }
 0x51f   : > { %v1441_v2 = vpop.f32.mrb[0].mxu0 }
 0x520   : > { %v1850_v3 = vpop.f32.mrb[1].mxu0 }
 0x521 PF: > { %v1449_v5 = vld [vmem:[#allocation4] sm:$0xff]  ;;  %p1678_p4 = scmp.ne.s32.totalorder %s2117_s12, 3 }
 0x522   : > { %v1450_v6 = vadd.f32 %v1449_v5, %v1441_v2  ;;  %v1679_v8 = vld [vmem:[%s2617_s8] ss:$0 sm:$0xff] (!%p1678_p4) }
 0x523   : > { %1455 = sbr.rel (%p1678_p4) target bundleno = 1327 (0x52f), region = 75 }
 0x524   : > { %1451 = vst.msk [vmem:[#allocation4] sm:$0xff] %vm1100_vm4, %v1450_v6 }
 0x52b   : > { %v1456_v7 = vld [vmem:[#allocation4] sm:$0xff] }
 0x52c   : > { %v1464_v9 = vadd.f32 %v1679_v8, %v1456_v7 }
 0x52e   : > { %1465 = vst.msk [vmem:[%s383_s9] sm:$0xff] %vm1100_vm4, %v1464_v9 }
 0x52f PF: > { %s1681_s16 = sshll.u32 %s2121_s13, 7  ;;  %s2644_s12 = sld [smem:[#allocation17_spill]] }
 0x530   : > { %s1481_s23 = sshll.u32 %s383_s9, 4  ;;  %s2646_s15 = sand.u32 1, %s2109_s10   ;;  %s1482_s23 = int_to_ptr.vmem [resolvable:$true] %s1481_s23 }
 0x531   : > { %s1467_s19 = scalar_lea.sflag [#allocation6], %s2646_s15  ;;  %s2023_s26 = scalar_lea.vmem %s1482_s23, 128 }
 0x532   : > { %p2024_p5 = scmp.ne.s32.totalorder %s1482_s23, %s2023_s26  ;;  %s2160_s11 = smov [#allocation5]  }
 0x533   : > { %s2027_s29 = sshll.u32 %s2160_s11, 4  ;;  %s2028_s29 = int_to_ptr.vmem [resolvable:$false] %s2027_s29 }
 0x534   : > { %p2025_p6 = pnand %p2024_p5, %p2260_p3  ;;  %s2029_s24 = scalar_lea.vmem %s2028_s29, 256 }
 0x535   : > { %s2645_s17 = smov %s2644_s12  ;;  %s2558_s18 = scalar_lea.hbm %s2644_s12, %s1681_s16 }
 0x536   : > { %p2026_p7 = pneg %p2025_p6  ;;  %p2030_p8 = scmp.lt.s32.totalorder %s1482_s23, %s2028_s29 }
 0x537   : > { %p2031_p10 = scmp.lt.s32.totalorder %s2029_s24, %s2023_s26 }
 0x539   : > { %p2032_p11 = por %p2031_p10, %p2030_p8 }
 0x53b   : > { %p2033_p12 = pnand %p2032_p11, %p2026_p7 }
 0x53d   : > { %2036 = shalt.err (!%p2033_p12)
}
 0x53e   : > { %s2037_s9 = scalar_lea.hbm %s2558_s18, 128  ;;  %s2041_s20 = scalar_lea.hbm %s2645_s17, 256 }
 0x53f   : > { %p2038_p13 = scmp.ne.s32.totalorder %s2558_s18, %s2037_s9  ;;  %p2042_p2 = scmp.lt.u32.totalorder %s2558_s18, %s2645_s17 }
 0x540   : > { %p2043_p4 = scmp.lt.u32.totalorder %s2041_s20, %s2037_s9  ;;  %p2045_p6 = scmp.lt.u32.totalorder %s2037_s9, %s2558_s18 }
 0x541   : > { %p2039_p0 = pnand %p2038_p13, %p2260_p3 }
 0x542   : > { %p2044_p5 = por %p2043_p4, %p2042_p2 }
 0x543   : > { %p2040_p1 = pneg %p2039_p0 }
 0x544   : > { %p2046_p7 = por %p2045_p6, %p2044_p5 }
 0x546   : > { %p2047_p8 = pnand %p2046_p7, %p2040_p1 }
 0x548   : > { %2050 = shalt.err (!%p2047_p8)
}
 0x549   : > { %1905 = dma.vmem_to_hbm [thread:$0]  (%p2260_p3), %s1482_s23, 128, %s2558_s18, %s1467_s19  }
 0x54a PF: > { %s2647_s14 = sld [smem:[#allocation12_spill]]  ;;  %s2648_s16 = sld [smem:[#allocation8_spill]] }
 0x550   : > { %p1911_p10 = scmp.ge.s32.totalorder %s2647_s14, 2  ;;  %s1493_s25 = sand.u32 1, %s2648_s16  }
 0x551   : > { %s1494_s12 = scalar_lea.sflag [#allocation6], %s1493_s25 }
 0x552   : > { %p1908_p11 = pnand %p1911_p10, %p2270_p9 }
 0x554   : > { %2100 = dma.done.wait (!%p1908_p11), %s1494_s12, 128  }
 0x555   : > { %2102 = vsyncadd (!%p1908_p11), %s1494_s12, 4294967168  ;;  %s22_s16 = sadd.s32 1, %s2647_s14   ;;  %s2650_s15 = sld [smem:[#allocation9_spill]] }
 0x556   : > { %p19_p12 = scmp.ge.s32.totalorder %s22_s16, 10   ;;  %s2651_s11 = sld [smem:[#allocation16_spill]] }
 0x557   : > { %s2652_s12 = sld [smem:[#allocation10_spill]]  ;;  %s2653_s13 = sld [smem:[#allocation11_spill]] }
 0x558   : > { %s2654_s14 = sld [smem:[#allocation13_spill]]  ;;  %s2655_s21 = sld [smem:[#allocation14_spill]] }
 0x559   : > { %s2656_s30 = smov %s2109_s10  ;;  %21 = sbr.rel (!%p19_p12) target bundleno = 7 (0x7), region = 151 }
 0x55b   : > { %s2657_s10 = smov %s2650_s15 }
 0x55e   : > { %s2658_s15 = smov %s2655_s21 }
 0x560   :  { %1499 = vsyncpa [#allocation6], 1 }
 0x561   :  { %1501 = vsyncpa [#allocation6 + $0x1], 1 }

</bundles_post_ra>
